<compile_context>
chip_gen: v6e
topology: v6e:2x2x1
jax: 0.10.0
libtpu: 0.0.40
codegen_flags: <defaults>
</compile_context>

<pallas_src>
import jax
import jax.numpy as jnp
from jax.experimental import pallas as pl
from jax.experimental.pallas import tpu as pltpu

BN_EPS = 1e-5
_VMEM_LIMIT = 32 * 1024 * 1024          # safe on v5e/v6e/v7x
_BLOCK_BUDGET = 8 * 1024 * 1024         # target double-buffered (in+out) bytes/step
_VPU_CONV_MAX_C1 = 16                   # VPU broadcast-FMA below this contraction
                                        # size (could be ~32 on v7x's 256x256 MXU)


def _round_up(a, b):
    return -(-a // b) * b


# --------------------------------------------------------------------------- #
# pass 1: input-side sufficient statistics (C2-independent)                    #
# --------------------------------------------------------------------------- #
def _stats_kernel(x_ref, xsum_ref, gram_ref):
    # x_ref:    (B_blk, C1, T) tile of samples
    # xsum_ref: (C1, T)  resident lane-dense accumulator (pure VALU adds)
    # gram_ref: (C1, C1) resident Gram accumulator (MXU, contraction over T)
    @pl.when((pl.program_id(1) == 0) & (pl.program_id(2) == 0))
    def _():
        xsum_ref[...] = jnp.zeros_like(xsum_ref)
        gram_ref[...] = jnp.zeros_like(gram_ref)

    x = x_ref[...].astype(jnp.float32)              # (B_blk, C1, T)
    xsum_ref[...] += jnp.sum(x, axis=0)             # (C1, T), no cross-lane reduce

    g = gram_ref[...]
    for b in range(x.shape[0]):                     # B_blk is small & static
        xb = x[b]                                   # (C1, T)
        # G += xb @ xb^T  (contract the long lane dim on the MXU)
        g = g + jax.lax.dot_general(
            xb, xb,
            dimension_numbers=(((1,), (1,)), ((), ())),
            preferred_element_type=jnp.float32)
    gram_ref[...] = g


# --------------------------------------------------------------------------- #
# pass 2: out = relu(w2 @ x + shift), BN scale already folded into w2           #
# --------------------------------------------------------------------------- #
def _conv1x1(w, x):
    """w: (C2, C1) f32, x: (C1, T) f32 -> (C2, T) f32.

    For tiny C1 use an unrolled VPU broadcast-FMA (skips an almost-empty MXU
    matmul); otherwise use the MXU.
    """
    C2, C1 = w.shape
    if C1 <= _VPU_CONV_MAX_C1:
        acc = w[:, 0:1] * x[0:1, :]
        for k in range(1, C1):
            acc = acc + w[:, k:k + 1] * x[k:k + 1, :]
        return acc
    return jnp.dot(w, x, preferred_element_type=jnp.float32)


def _apply_kernel(x_ref, w2_ref, shift_ref, o_ref):
    # x_ref: (B_blk, C1, T), w2_ref: (C2, C1), shift_ref: (C2, 1),
    # o_ref: (B_blk, C2, T) lane-dense NCHW output tile
    w2 = w2_ref[...]
    shift = shift_ref[...]
    for b in range(x_ref.shape[0]):
        xb = x_ref[b].astype(jnp.float32)           # (C1, T)
        y = _conv1x1(w2, xb) + shift                # (C2, T)
        o_ref[b] = jnp.maximum(y, 0.0).astype(o_ref.dtype)


# --------------------------------------------------------------------------- #
# tiling / blocking choice                                                      #
# --------------------------------------------------------------------------- #
def _choose_tiling(N, C1, C2, HW, budget_bytes):
    """Return (B_blk, tile, HW_pad, n_tiles).

    `tile` is a multiple of 128 sized so the double-buffered (x-in + out) f32
    blocks stay near `budget_bytes`, leaving ample headroom under the 32 MiB
    scoped VMEM limit (v7x physical VMEM is 64 MiB).  `B_blk` batches samples
    per grid step when HW alone is too small to amortise per-step overhead.
    """
    hw128 = _round_up(HW, 128)
    per_lane = 2 * (C1 + C2) * 4                    # dbl-buffered f32 bytes / lane
    lanes_budget = max(128, (budget_bytes // per_lane) // 128 * 128)

    tile = min(hw128, lanes_budget)
    hw_pad = _round_up(HW, tile)
    n_tiles = hw_pad // tile

    b_blk = 1
    for d in range(1, N + 1):
        if N % d == 0 and d * tile <= lanes_budget:
            b_blk = d
    return b_blk, tile, hw_pad, n_tiles


# --------------------------------------------------------------------------- #
# wrapper                                                                       #
# --------------------------------------------------------------------------- #
def conv_module_forward(x_nchw, w_conv, gamma, beta, *,
                        block_budget_bytes=_BLOCK_BUDGET):
    """x_nchw: (N, C1, H, W); w_conv: (C2, C1, 1, 1); gamma/beta: (C2,)."""
    N, C1, H, W = x_nchw.shape
    C2 = w_conv.shape[0]
    HW = H * W
    M = N * HW                                      # true element count (no pad)

    B_blk, tile, HW_pad, n_tiles = _choose_tiling(N, C1, C2, HW,
                                                  block_budget_bytes)

    x3 = x_nchw.reshape(N, C1, HW)                  # pure reshape, no transpose
    if HW_pad != HW:
        # zero columns contribute nothing to sum / Gram; sliced off at the end
        x3 = jnp.pad(x3, ((0, 0), (0, 0), (0, HW_pad - HW)))

    n_sb = N // B_blk                               # sample blocks
    n_split = 2 if (n_sb >= 2 and n_sb % 2 == 0) else 1   # v7x 2-TC split
    bps = n_sb // n_split

    # ---- pass 1: per-channel input statistics (C2-independent) --------------
    xsum_p, gram_p = pl.pallas_call(
        _stats_kernel,
        out_shape=(jax.ShapeDtypeStruct((n_split, C1, tile), jnp.float32),
                   jax.ShapeDtypeStruct((n_split, C1, C1), jnp.float32)),
        grid=(n_split, bps, n_tiles),
        in_specs=[
            pl.BlockSpec((B_blk, C1, tile),
                         lambda c, b, t: (c * bps + b, 0, t)),
        ],
        out_specs=(pl.BlockSpec((None, C1, tile), lambda c, b, t: (c, 0, 0)),
                   pl.BlockSpec((None, C1, C1), lambda c, b, t: (c, 0, 0))),
        compiler_params=pltpu.CompilerParams(
            dimension_semantics=("parallel", "arbitrary", "arbitrary"),
            vmem_limit_bytes=_VMEM_LIMIT),
    )(x3)

    # ---- tiny epilogue: derive BN scale/shift, fold scale into weights ------
    s = jnp.sum(xsum_p, axis=(0, 2))                # (C1,)  sum_x
    G = jnp.sum(gram_p, axis=0)                     # (C1, C1) sum_x x^T
    w_mat = w_conv.reshape(C2, C1).astype(jnp.float32)

    m = jnp.float32(M)
    mu_x = s / m                                    # (C1,)
    cov_x = G / m - jnp.outer(mu_x, mu_x)           # (C1, C1), biased (train mode)
    mean_y = w_mat @ mu_x                           # (C2,)
    var_y = jnp.maximum(jnp.sum((w_mat @ cov_x) * w_mat, axis=1), 0.0)  # (C2,)
    inv_std = jax.lax.rsqrt(var_y + BN_EPS)
    scale = gamma.astype(jnp.float32) * inv_std     # (C2,)
    shift = beta.astype(jnp.float32) - mean_y * scale
    w2 = w_mat * scale[:, None]                     # BN scale folded into conv
    shift_col = shift.reshape(C2, 1)

    # ---- pass 2: stream x, apply folded conv + shift + ReLU, store ----------
    out3 = pl.pallas_call(
        _apply_kernel,
        out_shape=jax.ShapeDtypeStruct((N, C2, HW_pad), x_nchw.dtype),
        grid=(n_sb, n_tiles),
        in_specs=[
            pl.BlockSpec((B_blk, C1, tile), lambda b, t: (b, 0, t)),
            pl.BlockSpec((C2, C1), lambda b, t: (0, 0)),
            pl.BlockSpec((C2, 1), lambda b, t: (0, 0)),
        ],
        out_specs=pl.BlockSpec((B_blk, C2, tile), lambda b, t: (b, 0, t)),
        compiler_params=pltpu.CompilerParams(
            dimension_semantics=("parallel", "parallel"),
            vmem_limit_bytes=_VMEM_LIMIT),
    )(x3, w2, shift_col)

    if HW_pad != HW:
        out3 = out3[:, :, :HW]
    return out3.reshape(N, C2, H, W)


# --------------------------------------------------------------------------- #
# reference + self-test                                                         #
# --------------------------------------------------------------------------- #
def reference_forward(x_nchw, w_conv, gamma, beta):
    """Pure-JAX reference mirroring PyTorch semantics (train-mode BN)."""
    N, C1, H, W = x_nchw.shape
    C2 = w_conv.shape[0]
    x_flat = jnp.transpose(x_nchw, (0, 2, 3, 1)).reshape(-1, C1)
    y = x_flat @ w_conv.reshape(C2, C1).T
    mean = jnp.mean(y, axis=0, keepdims=True)
    var = jnp.mean((y - mean) ** 2, axis=0, keepdims=True)
    y_hat = (y - mean) / jnp.sqrt(var + BN_EPS)
    out = jnp.maximum(y_hat * gamma[None, :] + beta[None, :], 0.0)
    return jnp.transpose(out.reshape(N, H, W, C2), (0, 3, 1, 2))


if __name__ == "__main__":
    key = jax.random.PRNGKey(0)

    # main shape (lane-aligned spatial)
    k_x, k_w, k_x2, k_w2 = jax.random.split(key, 4)
    N, C1, C2, H, W = 2, 4, 8, 16, 16
    x = jax.random.normal(k_x, (N, C1, H, W), dtype=jnp.float32)
    w_conv = jax.random.normal(k_w, (C2, C1, 1, 1), dtype=jnp.float32) * 0.1
    gamma = jnp.ones((C2,), dtype=jnp.float32)     # BatchNorm2d default init
    beta = jnp.zeros((C2,), dtype=jnp.float32)

    out = jax.block_until_ready(conv_module_forward(x, w_conv, gamma, beta))
    ref = reference_forward(x, w_conv, gamma, beta)
    assert out.shape == (N, C2, H, W)
    assert jnp.allclose(out, ref, atol=1e-4, rtol=1e-4)

    # second shape exercising the HW % 128 != 0 zero-padding path (14x14)
    N2, H2, W2 = 2, 14, 14
    x_b = jax.random.normal(k_x2, (N2, C1, H2, W2), dtype=jnp.float32)
    w_b = jax.random.normal(k_w2, (C2, C1, 1, 1), dtype=jnp.float32) * 0.1
    out_b = jax.block_until_ready(conv_module_forward(x_b, w_b, gamma, beta))
    ref_b = reference_forward(x_b, w_b, gamma, beta)
    assert out_b.shape == (N2, C2, H2, W2)
    assert jnp.allclose(out_b, ref_b, atol=1e-4, rtol=1e-4)

    print("KERNEL_OK")
</pallas_src>

<mosaic_0001>
module attributes {stable_mosaic.version = 11 : i64} {
  func.func @_stats_kernel(%arg0: i32, %arg1: i32, %arg2: i32, %arg3: memref<2x4x256xf32, #tpu.memory_space<vmem>>, %arg4: memref<1x4x256xf32, #tpu.memory_space<vmem>>, %arg5: memref<1x4x4xf32, #tpu.memory_space<vmem>>) attributes {dimension_semantics = [#tpu.dimension_semantics<parallel>, #tpu.dimension_semantics<arbitrary>, #tpu.dimension_semantics<arbitrary>], iteration_bounds = array<i64: 1, 1, 1>, scalar_prefetch = 0 : i64, scratch_operands = 0 : i64, tpu.core_type = #tpu.core_type<tc>, window_params = [{transform_indices = @transform_0, window_bounds = array<i64: 2, 4, 256>}, {transform_indices = @transform_1, window_bounds = array<i64: 1, 4, 256>}, {transform_indices = @transform_2, window_bounds = array<i64: 1, 4, 4>}]} {
    %c0_i32 = arith.constant 0 : i32
    %0 = arith.cmpi eq, %arg1, %c0_i32 : i32
    %c0_i32_0 = arith.constant 0 : i32
    %1 = arith.cmpi eq, %arg2, %c0_i32_0 : i32
    %2 = arith.andi %0, %1 : i1
    %3 = arith.extui %2 : i1 to i32
    %c0_i32_1 = arith.constant 0 : i32
    %4 = arith.cmpi ne, %3, %c0_i32_1 : i32
    scf.if %4 {
      %cst_18 = arith.constant 0.000000e+00 : f32
      %26 = vector.broadcast %cst_18 : f32 to vector<4x256xf32>
      %c0_19 = arith.constant 0 : index
      %c0_20 = arith.constant 0 : index
      %c0_21 = arith.constant 0 : index
      %27 = vector.load %arg4[%c0_19, %c0_20, %c0_21] : memref<1x4x256xf32, #tpu.memory_space<vmem>>, vector<1x4x256xf32>
      %28 = vector.shape_cast %27 : vector<1x4x256xf32> to vector<4x256xf32>
      %29 = vector.shape_cast %26 : vector<4x256xf32> to vector<1x4x256xf32>
      tpu.vector_store %arg4[%c0_19, %c0_20, %c0_21], %29 {strides = array<i32>} : memref<1x4x256xf32, #tpu.memory_space<vmem>>, vector<1x4x256xf32>,
      %cst_22 = arith.constant 0.000000e+00 : f32
      %30 = vector.broadcast %cst_22 : f32 to vector<4x4xf32>
      %c0_23 = arith.constant 0 : index
      %c0_24 = arith.constant 0 : index
      %c0_25 = arith.constant 0 : index
      %31 = vector.load %arg5[%c0_23, %c0_24, %c0_25] : memref<1x4x4xf32, #tpu.memory_space<vmem>>, vector<1x4x4xf32>
      %32 = vector.shape_cast %31 : vector<1x4x4xf32> to vector<4x4xf32>
      %33 = vector.shape_cast %30 : vector<4x4xf32> to vector<1x4x4xf32>
      tpu.vector_store %arg5[%c0_23, %c0_24, %c0_25], %33 {strides = array<i32>} : memref<1x4x4xf32, #tpu.memory_space<vmem>>, vector<1x4x4xf32>,
    } else {
    }
    %c0 = arith.constant 0 : index
    %c0_2 = arith.constant 0 : index
    %c0_3 = arith.constant 0 : index
    %5 = vector.load %arg3[%c0, %c0_2, %c0_3] : memref<2x4x256xf32, #tpu.memory_space<vmem>>, vector<2x4x256xf32>
    %c0_4 = arith.constant 0 : index
    %c0_5 = arith.constant 0 : index
    %c0_6 = arith.constant 0 : index
    %6 = vector.load %arg4[%c0_4, %c0_5, %c0_6] : memref<1x4x256xf32, #tpu.memory_space<vmem>>, vector<1x4x256xf32>
    %7 = vector.shape_cast %6 : vector<1x4x256xf32> to vector<4x256xf32>
    %cst = arith.constant dense<0.000000e+00> : vector<4x256xf32>
    %8 = vector.multi_reduction <add>, %5, %cst [0] : vector<2x4x256xf32> to vector<4x256xf32>
    %9 = arith.addf %7, %8 : vector<4x256xf32>
    %c0_7 = arith.constant 0 : index
    %c0_8 = arith.constant 0 : index
    %c0_9 = arith.constant 0 : index
    %10 = vector.load %arg4[%c0_7, %c0_8, %c0_9] : memref<1x4x256xf32, #tpu.memory_space<vmem>>, vector<1x4x256xf32>
    %11 = vector.shape_cast %10 : vector<1x4x256xf32> to vector<4x256xf32>
    %12 = vector.shape_cast %9 : vector<4x256xf32> to vector<1x4x256xf32>
    tpu.vector_store %arg4[%c0_7, %c0_8, %c0_9], %12 {strides = array<i32>} : memref<1x4x256xf32, #tpu.memory_space<vmem>>, vector<1x4x256xf32>,
    %c0_10 = arith.constant 0 : index
    %c0_11 = arith.constant 0 : index
    %c0_12 = arith.constant 0 : index
    %13 = vector.load %arg5[%c0_10, %c0_11, %c0_12] : memref<1x4x4xf32, #tpu.memory_space<vmem>>, vector<1x4x4xf32>
    %14 = vector.shape_cast %13 : vector<1x4x4xf32> to vector<4x4xf32>
    %15 = vector.extract_strided_slice %5 {offsets = [0, 0, 0], sizes = [1, 4, 256], strides = [1, 1, 1]} : vector<2x4x256xf32> to vector<1x4x256xf32>
    %16 = vector.shape_cast %15 : vector<1x4x256xf32> to vector<4x256xf32>
    %cst_13 = arith.constant dense<0.000000e+00> : vector<4x4xf32>
    %17 = tpu.matmul %16, %16, %cst_13 {dimension_numbers = #tpu.dot_dimension_numbers<[1], [1], [0], [0], [0, 0, 1, 0], [], []>} : vector<4x256xf32>, vector<4x256xf32>, vector<4x4xf32> -> vector<4x4xf32>
    %18 = arith.addf %14, %17 : vector<4x4xf32>
    %19 = vector.extract_strided_slice %5 {offsets = [1, 0, 0], sizes = [1, 4, 256], strides = [1, 1, 1]} : vector<2x4x256xf32> to vector<1x4x256xf32>
    %20 = vector.shape_cast %19 : vector<1x4x256xf32> to vector<4x256xf32>
    %cst_14 = arith.constant dense<0.000000e+00> : vector<4x4xf32>
    %21 = tpu.matmul %20, %20, %cst_14 {dimension_numbers = #tpu.dot_dimension_numbers<[1], [1], [0], [0], [0, 0, 1, 0], [], []>} : vector<4x256xf32>, vector<4x256xf32>, vector<4x4xf32> -> vector<4x4xf32>
    %22 = arith.addf %18, %21 : vector<4x4xf32>
    %c0_15 = arith.constant 0 : index
    %c0_16 = arith.constant 0 : index
    %c0_17 = arith.constant 0 : index
    %23 = vector.load %arg5[%c0_15, %c0_16, %c0_17] : memref<1x4x4xf32, #tpu.memory_space<vmem>>, vector<1x4x4xf32>
    %24 = vector.shape_cast %23 : vector<1x4x4xf32> to vector<4x4xf32>
    %25 = vector.shape_cast %22 : vector<4x4xf32> to vector<1x4x4xf32>
    tpu.vector_store %arg5[%c0_15, %c0_16, %c0_17], %25 {strides = array<i32>} : memref<1x4x4xf32, #tpu.memory_space<vmem>>, vector<1x4x4xf32>,
    return
  }
  func.func @transform_0(%arg0: i32, %arg1: i32, %arg2: i32) -> (i32, i32, i32) {
    %c1_i32 = arith.constant 1 : i32
    %0 = arith.muli %arg0, %c1_i32 : i32
    %1 = arith.addi %0, %arg1 : i32
    %c0_i32 = arith.constant 0 : i32
    %c0_i32_0 = arith.constant 0 : i32
    return %1, %c0_i32, %arg2 : i32, i32, i32
  }
  func.func @transform_1(%arg0: i32, %arg1: i32, %arg2: i32) -> (i32, i32, i32) {
    %c0_i32 = arith.constant 0 : i32
    %c0_i32_0 = arith.constant 0 : i32
    %c0_i32_1 = arith.constant 0 : i32
    return %arg0, %c0_i32, %c0_i32_0 : i32, i32, i32
  }
  func.func @transform_2(%arg0: i32, %arg1: i32, %arg2: i32) -> (i32, i32, i32) {
    %c0_i32 = arith.constant 0 : i32
    %c0_i32_0 = arith.constant 0 : i32
    %c0_i32_1 = arith.constant 0 : i32
    return %arg0, %c0_i32, %c0_i32_0 : i32, i32, i32
  }
}

</mosaic_0001>

<bundles_post_ra>
// kernel: tpu_custom_call.1
= control target key start
LH: loop header
LB: loop body
LE: loop exit
PB: predicated region body
PF: predicated region fallthrough
CT: control target
= control target key end

     0   :  { %8 = vsyncpa [#allocation3], 0  ;;  %s348_s0 = inlined_call_operand.hbm [shape: f32[2,4,256], index: 0, kind: input, shape index: {}]   ;;  %s349_s1 = inlined_call_operand.hbm [shape: f32[1,4,256], index: 1, kind: output, shape index: {0}]   ;;  %s350_s2 = inlined_call_operand.hbm [shape: f32[1,4,4], index: 2, kind: output, shape index: {1}]  }
   0x1   :  { %9 = vsyncpa [#allocation4], 0 }
   0x2   :  { %10 = vsyncpa [#allocation7], 0  ;;  %s312_s9 = smov [#allocation2]  }
   0x3   :  { %s21_s10 = sshll.u32 %s312_s9, 4  ;;  %s22_s10 = int_to_ptr.vmem [resolvable:$true] %s21_s10 }
   0x4   :  { %s254_s11 = scalar_lea.vmem %s22_s10, 256  ;;  %p259_p1 = scmp.lt.s32.totalorder %s22_s10, %s22_s10 }
   0x5   :  { %p255_p0 = scmp.ne.s32.totalorder %s22_s10, %s254_s11  ;;  %p260_p2 = scmp.lt.s32.totalorder %s254_s11, %s254_s11 }
   0x7   :  { %p261_p3 = por %p260_p2, %p259_p1 }
   0x9   :  { %p262_p4 = pnand %p261_p3, %p255_p0 }
   0xb   :  { %265 = shalt.err (!%p262_p4)
}
   0xc   :  { %s313_s12 = smov 128   ;;  %s314_s13 = smov 8  }
   0xd   :  { %27 = dma.hbm_to_vmem [thread:$0]  %s348_s0, 256, %s22_s10, [#allocation3], %s313_s12, %s313_s12, %s314_s13  }
   0xe   :  { %306 = dma.done.wait [#allocation3], 256  }
   0xf   :  { %307 = vsyncadd [#allocation3], 4294967040  ;;  %vm40_vm0 = vcmask 27648   ;;  %v315_v0 = vmov 0.0   ;;  %v42_v1 = vld [vmem:[#allocation2] sm:$0xff]  ;;  %vm51_vm1 = vcmask 1043456  }
  0x10   :  { %41 = vst.msk [vmem:[#allocation6] sm:$0xf] %vm40_vm0, %v315_v0  ;;  %v43_v2 = vld [vmem:[#allocation2 + $0x8] sm:$0xff]  ;;  %v47_v3 = vcombine.high %v42_v1, %v42_v1  ;;  %v52_v8 = vsel %vm51_vm1, %v42_v1, 0.0  ;;  %s316_s0 = smov [#allocation5]  }
  0x11   :  { %v48_v4 = vcombine.high %v43_v2, %v43_v2  ;;  %v53_v9 = vsel %vm51_vm1, %v43_v2, 0.0  ;;  %s215_s16 = sshll.u32 %s316_s0, 4  ;;  %s216_s16 = int_to_ptr.vmem [resolvable:$true] %s215_s16 }
  0x12   :  { %v55_v5 = vsel %vm51_vm1, %v47_v3, 0.0  ;;  %95 = vmatprep.subr.mxu0 %v47_v3  ;;  %129 = vmatprep.mubr.f32.mxu0 %v47_v3  ;;  %v54_v10 = vadd.f32 %v53_v9, %v52_v8  ;;  %s266_s17 = scalar_lea.vmem %s216_s16, 128  ;;  %p271_p6 = scmp.lt.s32.totalorder %s216_s16, %s216_s16 }
  0x13   :  { %v56_v6 = vsel %vm51_vm1, %v48_v4, 0.0  ;;  %166 = vmatprep.subr.mxu1 %v48_v4  ;;  %96 = vmatpush1.xpose.msra.mxu0 %v42_v1  ;;  %p267_p5 = scmp.ne.s32.totalorder %s216_s16, %s266_s17  ;;  %p272_p7 = scmp.lt.s32.totalorder %s266_s17, %s266_s17 }
  0x14   :  { %v57_v7 = vadd.f32 %v56_v6, %v55_v5  ;;  %167 = vmatpush1.xpose.msra.mxu1 %v43_v2  ;;  %200 = vmatprep.mubr.f32.mxu1 %v48_v4 }
  0x15   :  { %p273_p8 = por %p272_p7, %p271_p6 }
  0x16   :  { %130 = vmatmul.mubr.f32.vlgmr.msra.gmra.mxu0 %v42_v1  ;;  %v60_v11 = vcombine.low %v54_v10, %v57_v7 }
  0x17   :  { %201 = vmatmul.mubr.f32.vlgmr.msra.gmra.mxu1 %v43_v2  ;;  %p274_p9 = pnand %p273_p8, %p267_p5 }
  0x18   :  { %63 = vst [vmem:[#allocation5] sm:$0xff] %v60_v11 }
  0x19   :  { %277 = shalt.err (!%p274_p9)
}
  0x1a   :  { %218 = dma.vmem_to_hbm [thread:$0]  %s216_s16, 128, %s349_s1, [#allocation4]   ;;  %v64_v12 = vld [vmem:[#allocation6] sm:$0xf] }
  0x1b   :  { %s317_s20 = smov [#allocation6]  }
  0x1c   :  { %s225_s21 = sshll.u32 %s317_s20, 4  ;;  %s226_s21 = int_to_ptr.vmem [resolvable:$true] %s225_s21 }
  0x1d   :  { %s286_s22 = scalar_lea.vmem %s226_s21, 64  ;;  %p291_p11 = scmp.lt.s32.totalorder %s226_s21, %s226_s21 }
  0x1e   :  { %p287_p10 = scmp.ne.s32.totalorder %s226_s21, %s286_s22  ;;  %p292_p12 = scmp.lt.s32.totalorder %s286_s22, %s286_s22 }
  0x20   :  { %p293_p13 = por %p292_p12, %p291_p11 }
  0x22   :  { %p294_p0 = pnand %p293_p13, %p287_p10 }
  0xd6   :  { %v131_v13 = vpop.f32.mrf.mxu0 }
  0xd7   :  { %v202_v14 = vpop.f32.mrf.mxu1  ;;  %v135_v15 = vadd.f32 %v131_v13, %v64_v12 }
  0xd8   :  { %v133_v16 = vpop.f32.mrf.mxu0 }
  0xd9   :  { %v204_v17 = vpop.f32.mrf.mxu1  ;;  %v206_v18 = vadd.f32 %v202_v14, %v135_v15 }
  0xdb   :  { %208 = vst.msk [vmem:[#allocation6] sm:$0xf] %vm40_vm0, %v206_v18 }
  0xdc   :  { %297 = shalt.err (!%p294_p0)
}
  0xdd   :  { %228 = dma.vmem_to_hbm [thread:$0]  %s226_s21, 64, %s350_s2, [#allocation7]  }
  0xde   :  { %308 = dma.done.wait [#allocation4], 128  }
  0xdf   :  { %309 = vsyncadd [#allocation4], 4294967168 }
  0xe0   :  { %310 = dma.done.wait [#allocation7], 64  }
  0xe1   :  { %311 = vsyncadd [#allocation7], 4294967232 }
  0xe2   :  { %235 = vsyncpa [#allocation3], 1 }
  0xe3   :  { %236 = vsyncpa [#allocation4], 1 }
  0xe4   :  { %237 = vsyncpa [#allocation7], 1 }

</bundles_post_ra>
